<compile_context>
chip_gen: v6e
topology: v6e:2x2x1
jax: 0.10.0
libtpu: 0.0.40
codegen_flags: <defaults>
</compile_context>

<pallas_src>
import functools

import jax
import jax.numpy as jnp
from jax.experimental import pallas as pl
from jax.experimental.pallas import tpu as pltpu

LANE = 128          # vreg lane width; last dim is kept a multiple of this
_VV_FLOOR = 1e-35   # floor for ||v||^2 (keeps padded rows inert; see header)


def _cdiv(a, b):
    return -(-a // b)


def _rcp(x):
    """1/x via EUP vrcp (approx) + one Newton step -> ~1-ulp f32 accuracy."""
    r = pl.reciprocal(x, approx=True)
    return r * (2.0 - x * r)


# ---------------------------------------------------------------------------
# Single reflection (the module's forward), batched over rows of z:
#   z' = z - 2 v <v, z> / ||v||^2
# ---------------------------------------------------------------------------
def _householder_kernel(v_ref, z_ref, o_ref):
    v = v_ref[...].astype(jnp.float32)                             # (1, Dp)
    z = z_ref[...].astype(jnp.float32)                             # (B, Dp)
    vv = jnp.maximum(jnp.sum(v * v, keepdims=True), _VV_FLOOR)     # (1, 1)
    vtz = jnp.sum(z * v, axis=-1, keepdims=True)                   # (B, 1)
    scale = vtz * (2.0 * _rcp(vv))                                 # (B, 1)
    o_ref[...] = (z - scale * v).astype(o_ref.dtype)


def householder_transform(v, z):
    """v: (dim,), z: (dim,) or (B, dim) -> z - 2 v <v,z> / ||v||^2 (per row)."""
    # NOTE(perf): for a standalone un-batched call at tiny dim, the plain XLA
    # expression fuses into the surrounding graph with no launch overhead; the
    # Pallas path pays off for batched z and for the fused chain below.
    squeeze = z.ndim == 1
    Z = z[None, :] if squeeze else z
    dim = v.shape[-1]
    assert Z.shape[-1] == dim
    B = Z.shape[0]
    Dp = LANE * _cdiv(dim, LANE)

    vp = jnp.pad(v, (0, Dp - dim))[None, :]                        # (1, Dp)
    Zp = jnp.pad(Z, ((0, 0), (0, Dp - dim)))                       # (B, Dp)

    out = pl.pallas_call(
        _householder_kernel,
        out_shape=jax.ShapeDtypeStruct((B, Dp), z.dtype),
        in_specs=[
            pl.BlockSpec((1, Dp), lambda *_: (0, 0)),
            pl.BlockSpec((B, Dp), lambda *_: (0, 0)),
        ],
        out_specs=pl.BlockSpec((B, Dp), lambda *_: (0, 0)),
    )(vp, Zp)

    out = out[:, :dim]
    return out[0] if squeeze else out


# ---------------------------------------------------------------------------
# Fused chain of L reflections, layer axis blocked, z resident in VMEM.
# ---------------------------------------------------------------------------
def _householder_chain_kernel(layer_block, v_ref, z_ref, o_ref, z_acc):
    lb = pl.program_id(1)

    @pl.when(lb == 0)
    def _():
        z_acc[...] = z_ref[...].astype(jnp.float32)

    V = v_ref[...].astype(jnp.float32)                             # (Lb, Dp)
    # Hoisted off the serial z-dependency: per-layer 2/||v||^2-scaled directions.
    vv = jnp.maximum(jnp.sum(V * V, axis=-1, keepdims=True), _VV_FLOOR)  # (Lb,1)
    W = (2.0 * V) * _rcp(vv)                                       # (Lb, Dp)

    z = z_acc[...]                                                 # (Bb, Dp) f32
    # Static Python loop == full unroll with static slice indices; per-layer
    # critical path is lane-reduce -> mul -> sub. Zero-padded layers are inert
    # (vtz == 0 and W row == 0 thanks to the vv floor).
    for l in range(layer_block):
        v_l = V[l:l + 1, :]                                        # (1, Dp)
        w_l = W[l:l + 1, :]                                        # (1, Dp)
        vtz = jnp.sum(z * v_l, axis=-1, keepdims=True)             # (Bb, 1)
        z = z - vtz * w_l
    z_acc[...] = z

    @pl.when(lb == pl.num_programs(1) - 1)
    def _():
        o_ref[...] = z.astype(o_ref.dtype)


def householder_chain(V, z, *, max_layer_block=32, max_batch_block=256):
    """Apply L sequential Householder reflections (rows of V) to z (per row if
    z is batched) in ONE pallas_call."""
    assert V.ndim == 2
    squeeze = z.ndim == 1
    Z = z[None, :] if squeeze else z
    L, dim = V.shape
    B = Z.shape[0]
    assert Z.shape[-1] == dim

    Dp = LANE * _cdiv(dim, LANE)

    # Layer blocking: Lb a multiple of 8 (sublane-aligned V blocks), chosen to
    # minimize zero-row padding while amortizing per-grid-step overhead.
    n_lb = _cdiv(L, max_layer_block)
    Lb = 8 * _cdiv(_cdiv(L, n_lb), 8)
    n_lb = _cdiv(L, Lb)
    Lpad = n_lb * Lb

    # Batch blocking: one full block for small B; multiple-of-8 blocks and a
    # "parallel" grid axis (fills both TensorCores on v7x) for large B.
    if B <= max_batch_block:
        Bb, n_bb = B, 1
    else:
        Bb = max_batch_block
        n_bb = _cdiv(B, Bb)
    Bpad = n_bb * Bb

    # NOTE(perf): V is a parameter with a fixed shape -- in a real model, pad
    # it once at init rather than on every forward call.
    Vp = jnp.pad(V, ((0, Lpad - L), (0, Dp - dim)))
    Zp = jnp.pad(Z, ((0, Bpad - B), (0, Dp - dim)))

    out = pl.pallas_call(
        functools.partial(_householder_chain_kernel, Lb),
        out_shape=jax.ShapeDtypeStruct((Bpad, Dp), z.dtype),
        grid=(n_bb, n_lb),
        in_specs=[
            pl.BlockSpec((Lb, Dp), lambda b, l: (l, 0)),           # V layer block
            pl.BlockSpec((Bb, Dp), lambda b, l: (b, 0)),           # z batch block
        ],
        out_specs=pl.BlockSpec((Bb, Dp), lambda b, l: (b, 0)),
        scratch_shapes=[pltpu.VMEM((Bb, Dp), jnp.float32)],
        compiler_params=pltpu.CompilerParams(
            dimension_semantics=("parallel", "arbitrary")),
    )(Vp, Zp)

    out = out[:B, :dim]
    return out[0] if squeeze else out


def _parameter_init(key, low, high, size):
    # mirrors: (low - high) * rand(size) + high
    shape = size if isinstance(size, tuple) else (size,)
    r = jax.random.uniform(key, shape, dtype=jnp.float32)
    return (low - high) * r + high


if __name__ == "__main__":
    dim = 32
    key = jax.random.PRNGKey(0)
    k_v, k_z, k_zb, k_chain = jax.random.split(key, 4)

    v = _parameter_init(k_v, -0.01, 0.01, dim)
    z = jax.random.normal(k_z, (dim,), dtype=jnp.float32)

    # --- module forward: single reflection, single vector -----------------
    z_new = householder_transform(v, z)
    jax.block_until_ready(z_new)
    ref = z - 2.0 * v * jnp.dot(v, z) / jnp.sum(v ** 2)
    assert jnp.allclose(z_new, ref, atol=1e-5, rtol=1e-5), "single reflection mismatch"

    # --- batched single reflection -----------------------------------------
    B = 4
    Zb = jax.random.normal(k_zb, (B, dim), dtype=jnp.float32)
    Zb_new = householder_transform(v, Zb)
    jax.block_until_ready(Zb_new)
    ref_b = Zb - 2.0 * (Zb @ v)[:, None] * v[None, :] / jnp.sum(v ** 2)
    assert jnp.allclose(Zb_new, ref_b, atol=1e-5, rtol=1e-5), "batched reflection mismatch"

    # --- fused chain of L reflections (L not a multiple of the layer block) --
    L = 12
    V = _parameter_init(k_chain, -0.01, 0.01, (L, dim))

    Zc = householder_chain(V, Zb)
    jax.block_until_ready(Zc)
    ref_c = Zb
    for l in range(L):
        vl = V[l]
        ref_c = ref_c - 2.0 * (ref_c @ vl)[:, None] * vl[None, :] / jnp.sum(vl ** 2)
    assert jnp.allclose(Zc, ref_c, atol=1e-4, rtol=1e-4), "batched chain mismatch"

    zc1 = householder_chain(V, z)
    jax.block_until_ready(zc1)
    ref1 = z
    for l in range(L):
        vl = V[l]
        ref1 = ref1 - 2.0 * vl * jnp.dot(vl, ref1) / jnp.sum(vl ** 2)
    assert jnp.allclose(zc1, ref1, atol=1e-4, rtol=1e-4), "chain mismatch"

    # TODO(synk): log_det() in the PyTorch module is the constant 0; nothing to kernelize.
    # TODO(synk): for very large batches vs. few layers, composing the reflections
    # into an explicit Q (compact-WY) and using one MXU matmul is the model-level
    # alternative; not implemented here.
    print("KERNEL_OK")
</pallas_src>

<mosaic_0001>
module attributes {stable_mosaic.version = 11 : i64} {
  func.func @_householder_kernel(%arg0: memref<1x128xf32, #tpu.memory_space<vmem>>, %arg1: memref<1x128xf32, #tpu.memory_space<vmem>>, %arg2: memref<1x128xf32, #tpu.memory_space<vmem>>) attributes {dimension_semantics = [], scalar_prefetch = 0 : i64, scratch_operands = 0 : i64, tpu.core_type = #tpu.core_type<tc>} {
    %c0 = arith.constant 0 : index
    %c0_0 = arith.constant 0 : index
    %0 = vector.load %arg0[%c0, %c0_0] : memref<1x128xf32, #tpu.memory_space<vmem>>, vector<1x128xf32>
    %c0_1 = arith.constant 0 : index
    %c0_2 = arith.constant 0 : index
    %1 = vector.load %arg1[%c0_1, %c0_2] : memref<1x128xf32, #tpu.memory_space<vmem>>, vector<1x128xf32>
    %2 = arith.mulf %0, %0 : vector<1x128xf32>
    %3 = vector.shape_cast %2 : vector<1x128xf32> to vector<1x1x128xf32>
    %cst = arith.constant dense<0.000000e+00> : vector<1xf32>
    %4 = vector.multi_reduction <add>, %3, %cst [1, 2] : vector<1x1x128xf32> to vector<1xf32>
    %5 = vector.shape_cast %4 : vector<1xf32> to vector<1x1x1xf32>
    %6 = vector.extract %5[0, 0, 0] : f32 from vector<1x1x1xf32>
    %7 = vector.broadcast %6 : f32 to vector<1x1xf32>
    %cst_3 = arith.constant 1.000000e-35 : f32
    %8 = vector.broadcast %cst_3 : f32 to vector<1x1xf32>
    %9 = arith.maximumf %7, %8 : vector<1x1xf32>
    %10 = arith.mulf %1, %0 : vector<1x128xf32>
    %cst_4 = arith.constant dense<0.000000e+00> : vector<1xf32>
    %11 = vector.multi_reduction <add>, %10, %cst_4 [1] : vector<1x128xf32> to vector<1xf32>
    %12 = vector.shape_cast %11 : vector<1xf32> to vector<1x1xf32>
    %13 = tpu.reciprocal %9 {approx = true} : vector<1x1xf32> -> vector<1x1xf32>
    %14 = arith.mulf %9, %13 : vector<1x1xf32>
    %cst_5 = arith.constant 2.000000e+00 : f32
    %15 = vector.broadcast %cst_5 : f32 to vector<1x1xf32>
    %16 = arith.subf %15, %14 : vector<1x1xf32>
    %17 = arith.mulf %13, %16 : vector<1x1xf32>
    %cst_6 = arith.constant 2.000000e+00 : f32
    %18 = vector.broadcast %cst_6 : f32 to vector<1x1xf32>
    %19 = arith.mulf %18, %17 : vector<1x1xf32>
    %20 = arith.mulf %12, %19 : vector<1x1xf32>
    %21 = vector.broadcast %20 : vector<1x1xf32> to vector<1x128xf32>
    %22 = arith.mulf %21, %0 : vector<1x128xf32>
    %23 = arith.subf %1, %22 : vector<1x128xf32>
    %c0_7 = arith.constant 0 : index
    %c0_8 = arith.constant 0 : index
    %24 = vector.load %arg2[%c0_7, %c0_8] : memref<1x128xf32, #tpu.memory_space<vmem>>, vector<1x128xf32>
    tpu.vector_store %arg2[%c0_7, %c0_8], %23 {strides = array<i32>} : memref<1x128xf32, #tpu.memory_space<vmem>>, vector<1x128xf32>,
    return
  }
}

</mosaic_0001>

<bundles_post_ra>
// kernel: tpu_custom_call.1
= control target key start
LH: loop header
LB: loop body
LE: loop exit
PB: predicated region body
PF: predicated region fallthrough
CT: control target
= control target key end

     0   :  { %7 = vsyncpa [#allocation3], 0  ;;  %s144_s0 = inlined_call_operand.hbm [shape: f32[1,128], index: 0, kind: input, shape index: {}]   ;;  %s145_s1 = inlined_call_operand.vmem [shape: f32[1,128], index: 1, kind: input, shape index: {}]   ;;  %s146_s2 = inlined_call_operand.hbm [shape: f32[1,128], index: 2, kind: output, shape index: {}]  }
   0x1   :  { %8 = vsyncpa [#allocation4], 0  ;;  %s118_s9 = smov [#allocation2]  }
   0x2   :  { %s15_s10 = sshll.u32 %s118_s9, 4  ;;  %s16_s10 = int_to_ptr.vmem [resolvable:$true] %s15_s10 }
   0x3   :  { %s82_s11 = scalar_lea.vmem %s16_s10, 16  ;;  %s86_s12 = scalar_lea.vmem %s16_s10, 32 }
   0x4   :  { %p83_p0 = scmp.ne.s32.totalorder %s16_s10, %s82_s11  ;;  %p87_p1 = scmp.lt.s32.totalorder %s16_s10, %s16_s10 }
   0x5   :  { %p88_p2 = scmp.lt.s32.totalorder %s86_s12, %s82_s11 }
   0x7   :  { %p89_p3 = por %p88_p2, %p87_p1 }
   0x9   :  { %p90_p4 = pnand %p89_p3, %p83_p0 }
   0xb   :  { %93 = shalt.err (!%p90_p4)
}
   0xc   :  { %18 = dma.hbm_to_vmem [thread:$0]  %s144_s0, 16, %s16_s10, [#allocation3]  }
   0xd   :  { %114 = dma.done.wait [#allocation3], 16  }
   0xe   :  { %115 = vsyncadd [#allocation3], 4294967280  ;;  %v24_v0 = vld [vmem:[#allocation2] sm:$0x1]  ;;  %vm27_vm0 = vcmask 1040384  }
   0xf   :  { %v25_v1 = vld [vmem:[%s145_s1] sm:$0x1]  ;;  %v26_v2 = vmul.f32 %v24_v0, %v24_v0  ;;  %s119_s1 = smov [#allocation5]  }
  0x10   :  { %v40_v3 = vmul.f32 %v25_v1, %v24_v0  ;;  %s59_s17 = sshll.u32 %s119_s1, 4  ;;  %s60_s17 = int_to_ptr.vmem [resolvable:$true] %s59_s17 }
  0x11   :  { %v28_v4 = vsel %vm27_vm0, %v26_v2, 0.0  ;;  %s94_s18 = scalar_lea.vmem %s60_s17, 16  ;;  %s98_s19 = scalar_lea.vmem %s60_s17, 32 }
  0x12   :  { %29 = vadd.xlane.f32.xlu0 %v28_v4  ;;  %v41_v5 = vsel %vm27_vm0, %v40_v3, 0.0  ;;  %p95_p5 = scmp.ne.s32.totalorder %s60_s17, %s94_s18  ;;  %p99_p6 = scmp.lt.s32.totalorder %s60_s17, %s60_s17 }
  0x13   :  { %p100_p7 = scmp.lt.s32.totalorder %s98_s19, %s94_s18 }
  0x15   :  { %p101_p8 = por %p100_p7, %p99_p6 }
  0x16   :  { %42 = vadd.xlane.f32.xlu0 %v41_v5 }
  0x17   :  { %p102_p9 = pnand %p101_p8, %p95_p5 }
  0x9b   :  { %v30_v6 = vpop.xlane.xlu0 %29 }
  0x9c   :  { %v31_v7 = vrot.slane %v30_v6, 4 }
  0x9e   :  { %v32_v8 = vadd.f32 %v31_v7, %v30_v6 }
  0x9f   :  { %v43_v19 = vpop.xlane.xlu0 %42 }
  0xa0   :  { %v33_v9 = vrot.slane %v32_v8, 2 }
  0xa2   :  { %v34_v10 = vadd.f32 %v33_v9, %v32_v8 }
  0xa4   :  { %v35_v11 = vrot.slane %v34_v10, 1 }
  0xa6   :  { %v36_v12 = vadd.f32 %v35_v11, %v34_v10 }
  0xa8   :  { %68 = vpush %v36_v12 }
  0xd9   :  { %s69_s0 = spop %68 }
  0xda   :  { %v38_v13 = vstv %s69_s0 }
  0xdb   :  { %v39_v14 = vmax.f32 %v38_v13, 1e-35 }
  0xdd   :  { %72 = vrcp.f32 %v39_v14 }
  0xea   :  { %v73_v15 = vpop.eup %72 }
  0xeb   :  { %v45_v16 = vmul.f32 %v73_v15, %v39_v14 }
  0xed   :  { %v46_v17 = vsub.f32 2.0, %v45_v16 }
  0xef   :  { %v47_v18 = vmul.f32 %v73_v15, %v46_v17 }
  0xf1   :  { %v48_v20 = vmul.f32 2.0, %v47_v18 }
  0xf3   :  { %v49_v21 = vmul.f32 %v48_v20, %v43_v19 }
  0xf5   :  { %v50_v22 = vmul.f32 %v49_v21, %v24_v0 }
  0xf7   :  { %v51_v23 = vsub.f32 %v25_v1, %v50_v22 }
  0xf9   :  { %52 = vst [vmem:[#allocation5] sm:$0x1] %v51_v23 }
  0xfa   :  { %105 = shalt.err (!%p102_p9)
}
  0xfb   :  { %62 = dma.vmem_to_hbm [thread:$0]  %s60_s17, 16, %s146_s2, [#allocation4]  }
  0xfc   :  { %116 = dma.done.wait [#allocation4], 16  }
  0xfd   :  { %117 = vsyncadd [#allocation4], 4294967280 }
  0xfe   :  { %66 = vsyncpa [#allocation3], 1 }
  0xff   :  { %67 = vsyncpa [#allocation4], 1 }

</bundles_post_ra>
